<compile_context>
chip_gen: v7x
topology: tpu7x:2x2x1
jax: 0.10.0
libtpu: 0.0.40
codegen_flags: <defaults>
</compile_context>

<pallas_src>
import numpy as np
import jax
import jax.numpy as jnp
from jax.experimental import pallas as pl
from jax.experimental.pallas import tpu as pltpu

# ----- config (small, consistent with the PyTorch module) -----
B = 2              # batch
S = 8              # sequence length
H = 32             # hidden_size
NUM_HEADS = 4      # num_attention_heads
HEAD_DIM = 8       # head_dim (H // NUM_HEADS)
NUM_KV_HEADS = 2   # num_key_value_heads (GQA)
GROUPS = NUM_HEADS // NUM_KV_HEADS
FFN = 64           # ffn_hidden_size
EPS = 1e-5

T = B * S                        # tokens packed on the sublane axis (16)
Q_W = NUM_HEADS * HEAD_DIM       # 32
KV_W = NUM_KV_HEADS * HEAD_DIM   # 16
QKV_W = Q_W + 2 * KV_W           # 64 (fused q|k|v projection width)
NEG_INF = -1e9

# TODO(synk): dropout_p > 0 inside F.scaled_dot_product_attention is not
#             implemented (eval / inference path, dropout_prob = 0.0).


def transformer_layer_kernel(x_ref, mask_ref, rope_ref, wqkv_ref, bqkv_ref,
                             wo_ref, w1_ref, w2_ref, gains_ref,
                             o_ref, attn_scr):
    """Full transformer layer over all B*S tokens in one invocation."""
    f32 = jnp.float32
    x = x_ref[...]                       # (T, H)
    gains = gains_ref[...]               # (2, H): row 0 = input_norm, row 1 = post_attn_norm

    def rmsnorm(h, g_row):
        var = jnp.mean(h * h, axis=-1, keepdims=True)
        return g_row * (h * jax.lax.rsqrt(var + EPS))

    # ---------------- attention ----------------
    h = rmsnorm(x, gains[0:1, :])
    # fused QKV projection (softmax scale 1/sqrt(Dh) is pre-folded into Q columns)
    qkv = jnp.dot(h, wqkv_ref[...], preferred_element_type=f32) + bqkv_ref[...]

    # Interleaved-pair RoPE:  rope(x) = x * cos + pair_swap(x) * sin_signed,
    # where pair_swap([x0,x1,x2,x3,...]) = [x1,x0,x3,x2,...].  Implemented with
    # two pltpu.roll lane rotations (XLU slot, not MXU) plus a parity select.
    # A rolled lane-iota probes the hardware roll direction at runtime so the
    # result does not depend on the roll sign convention.
    lane = jax.lax.broadcasted_iota(jnp.int32, qkv.shape, 1)
    partner = (lane ^ 1).astype(f32)                      # in-pair partner lane
    roll_a = pltpu.roll(qkv, 1, axis=1)
    roll_b = pltpu.roll(qkv, QKV_W - 1, axis=1)           # == roll by -1 (mod 64)
    src_a = pltpu.roll(lane.astype(f32), 1, axis=1)       # source lane feeding roll_a
    swapped = jnp.where(src_a == partner, roll_a, roll_b)
    cos_t = rope_ref[0:T, :]             # (T, QKV_W); v-columns are 1
    sin_t = rope_ref[T:2 * T, :]         # (T, QKV_W); interleaved signed sin; v-columns are 0
    qkv = qkv * cos_t + swapped * sin_t

    q = qkv[:, :Q_W]                     # (T, nH*Dh), already scaled
    k = qkv[:, Q_W:Q_W + KV_W]           # (T, nKV*Dh)
    v = qkv[:, Q_W + KV_W:]              # (T, nKV*Dh)

    # All head scores stacked on the sublane axis -> a single softmax.
    mask = mask_ref[...]                 # (T, T) block-diagonal causal additive mask
    nt = (((1,), (1,)), ((), ()))        # contract last dims: q @ k^T without a transpose op
    s_list = []
    for hd in range(NUM_HEADS):
        kv = hd // GROUPS                # GQA head -> kv-head mapping (repeat_interleave)
        qh = q[:, hd * HEAD_DIM:(hd + 1) * HEAD_DIM]
        kh = k[:, kv * HEAD_DIM:(kv + 1) * HEAD_DIM]
        s_list.append(jax.lax.dot_general(qh, kh, nt, preferred_element_type=f32) + mask)
    s_all = jnp.concatenate(s_list, axis=0)               # (nH*T, T)
    m = jnp.max(s_all, axis=-1, keepdims=True)
    p = jnp.exp(s_all - m)
    p = p / jnp.sum(p, axis=-1, keepdims=True)            # cross-batch entries are exactly 0

    # Per-head P @ V written straight into the output layout via VMEM scratch
    # (no lane concatenate of sub-vreg pieces).
    for hd in range(NUM_HEADS):
        kv = hd // GROUPS
        ph = p[hd * T:(hd + 1) * T, :]
        vh = v[:, kv * HEAD_DIM:(kv + 1) * HEAD_DIM]
        attn_scr[:, hd * HEAD_DIM:(hd + 1) * HEAD_DIM] = jnp.dot(
            ph, vh, preferred_element_type=f32)

    attn = jnp.dot(attn_scr[...], wo_ref[...], preferred_element_type=f32)
    x1 = x + attn                                          # residual 1

    # ---------------- SwiGLU feed-forward ----------------
    h2 = rmsnorm(x1, gains[1:2, :])
    a = jnp.dot(h2, w1_ref[...], preferred_element_type=f32)   # (T, 2*FFN)
    gate = a[:, :FFN]
    up = a[:, FFN:]
    ff = jnp.dot(gate * jax.nn.sigmoid(gate) * up, w2_ref[...],
                 preferred_element_type=f32)
    o_ref[...] = x1 + ff                                   # residual 2


# -------------------- wrapper: operand packing + pallas_call --------------------
def _pack_rope_tables(cos, sin):
    """Build the packed (2*T, QKV_W) RoPE table: rows [0:T]=cos, [T:2T]=signed sin.

    cos/sin: (S, HEAD_DIM//2) from gen_rope_cache.  Q and K column blocks get the
    interleaved tables; the V column block gets cos=1 / sin=0 so RoPE is a no-op
    there and the whole fused qkv row can be rotated in one shot.
    """
    cos_i = jnp.repeat(cos, 2, axis=-1)                               # (S, Dh) interleaved
    sign = jnp.tile(jnp.array([-1.0, 1.0], jnp.float32), HEAD_DIM // 2)
    sin_s = jnp.repeat(sin, 2, axis=-1) * sign                        # signed, interleaved
    cos_row = jnp.concatenate([jnp.tile(cos_i, (1, NUM_HEADS)),
                               jnp.tile(cos_i, (1, NUM_KV_HEADS)),
                               jnp.ones((S, KV_W), jnp.float32)], axis=-1)
    sin_row = jnp.concatenate([jnp.tile(sin_s, (1, NUM_HEADS)),
                               jnp.tile(sin_s, (1, NUM_KV_HEADS)),
                               jnp.zeros((S, KV_W), jnp.float32)], axis=-1)
    return jnp.concatenate([jnp.tile(cos_row, (B, 1)),
                            jnp.tile(sin_row, (B, 1))], axis=0)       # (2T, QKV_W)


def _pack_mask(mask):
    """(B,S,S) additive mask -> (T,T) block-diagonal mask (cross-batch = -1e9)."""
    big = jnp.full((T, T), NEG_INF, jnp.float32)
    for b in range(B):
        big = big.at[b * S:(b + 1) * S, b * S:(b + 1) * S].set(mask[b])
    return big


def transformer_layer(x, mask, cos, sin, params):
    wq, bq, wk, bk, wv, bv, wo, w1, w2, gin, gpost = params
    scale = 1.0 / (HEAD_DIM ** 0.5)
    # fused QKV weight/bias, softmax scale folded into the Q columns (trace time)
    wqkv = jnp.concatenate([wq * scale, wk, wv], axis=1)   # (H, QKV_W)
    bqkv = jnp.concatenate([bq * scale, bk, bv], axis=1)   # (1, QKV_W)
    gains = jnp.concatenate([gin, gpost], axis=0)          # (2, H)
    rope_tab = _pack_rope_tables(cos, sin)                 # (2T, QKV_W)
    mask_big = _pack_mask(mask)                            # (T, T)
    x2 = x.reshape(T, H)                                   # pack batch on sublanes

    vmem = pl.BlockSpec(memory_space=pltpu.MemorySpace.VMEM)   # whole array in VMEM
    out = pl.pallas_call(
        transformer_layer_kernel,
        out_shape=jax.ShapeDtypeStruct((T, H), jnp.float32),
        in_specs=[vmem] * 9,
        out_specs=vmem,
        scratch_shapes=[pltpu.VMEM((T, H), jnp.float32)],      # attention assembly scratch
    )(x2, mask_big, rope_tab, wqkv, bqkv, wo, w1, w2, gains)
    return out.reshape(B, S, H)


# -------------------- plain-JAX reference (mirrors PyTorch forward) --------------------
def reference(x, mask, cos, sin, params):
    wq, bq, wk, bk, wv, bv, wo, w1, w2, gin, gpost = params

    def rms(h, g):
        var = jnp.mean(h.astype(jnp.float32) ** 2, axis=-1, keepdims=True)
        return g * (h * jax.lax.rsqrt(var + EPS))

    def rope(t):
        Bn, Sn, nh, Dh = t.shape
        tr = t.reshape(Bn, Sn, nh, Dh // 2, 2)
        t0, t1 = tr[..., 0], tr[..., 1]
        c = cos[None, :, None, :]
        s = sin[None, :, None, :]
        out = jnp.stack([t0 * c - t1 * s, t1 * c + t0 * s], axis=-1)
        return out.reshape(Bn, Sn, nh, Dh)

    h = rms(x, gin)
    q = (h @ wq + bq).reshape(B, S, NUM_HEADS, HEAD_DIM)
    k = (h @ wk + bk).reshape(B, S, NUM_KV_HEADS, HEAD_DIM)
    v = (h @ wv + bv).reshape(B, S, NUM_KV_HEADS, HEAD_DIM)
    q, k = rope(q), rope(k)
    q = q.transpose(0, 2, 1, 3)
    k = k.transpose(0, 2, 1, 3)
    v = v.transpose(0, 2, 1, 3)
    k = jnp.repeat(k, GROUPS, axis=1)
    v = jnp.repeat(v, GROUPS, axis=1)
    scores = jnp.einsum("bhqd,bhkd->bhqk", q, k) / np.sqrt(HEAD_DIM) + mask[:, None]
    p = jax.nn.softmax(scores, axis=-1)
    o = jnp.einsum("bhqk,bhkd->bhqd", p, v).transpose(0, 2, 1, 3).reshape(B, S, H)
    x1 = x + o @ wo
    a = rms(x1, gpost) @ w1
    gate, up = a[..., :FFN], a[..., FFN:]
    return x1 + (gate * jax.nn.sigmoid(gate) * up) @ w2


# -------------------- parameter / input construction --------------------
def gen_rope_cache(seq_len, n_elem, base=10000.0):
    theta = 1.0 / (base ** (jnp.arange(0, n_elem, 2, dtype=jnp.float32) / n_elem))
    idx_theta = jnp.outer(jnp.arange(seq_len, dtype=jnp.float32), theta)
    return jnp.cos(idx_theta), jnp.sin(idx_theta)   # each (S, n_elem // 2)


if __name__ == "__main__":
    key = jax.random.PRNGKey(0)
    ks = jax.random.split(key, 16)

    def rnd(k, shape, scale=0.05):
        return scale * jax.random.normal(k, shape, dtype=jnp.float32)

    # weights stored [in, out]; biases / norm gains as (1, N) rows
    wq = rnd(ks[0], (H, NUM_HEADS * HEAD_DIM))
    bq = rnd(ks[1], (1, NUM_HEADS * HEAD_DIM))
    wk = rnd(ks[2], (H, NUM_KV_HEADS * HEAD_DIM))
    bk = rnd(ks[3], (1, NUM_KV_HEADS * HEAD_DIM))
    wv = rnd(ks[4], (H, NUM_KV_HEADS * HEAD_DIM))
    bv = rnd(ks[5], (1, NUM_KV_HEADS * HEAD_DIM))
    wo = rnd(ks[6], (NUM_HEADS * HEAD_DIM, H))
    w1 = rnd(ks[7], (H, 2 * FFN))
    w2 = rnd(ks[8], (FFN, H))
    gin = 1.0 + rnd(ks[9], (1, H), 0.1)
    gpost = 1.0 + rnd(ks[10], (1, H), 0.1)
    params = (wq, bq, wk, bk, wv, bv, wo, w1, w2, gin, gpost)

    x = jax.random.normal(ks[11], (B, S, H), dtype=jnp.float32)

    # causal additive attention mask, shape (B, S, S)
    causal = jnp.tril(jnp.ones((S, S), dtype=bool))
    mask = jnp.where(causal, 0.0, NEG_INF).astype(jnp.float32)
    mask = jnp.broadcast_to(mask, (B, S, S))

    # RoPE tables (module's gen_rope_cache semantics)
    cos, sin = gen_rope_cache(S, HEAD_DIM)          # (S, HEAD_DIM//2) each

    out = transformer_layer(x, mask, cos, sin, params)
    out = jax.block_until_ready(out)

    ref = jax.block_until_ready(reference(x, mask, cos, sin, params))
    np.testing.assert_allclose(np.asarray(out), np.asarray(ref), rtol=1e-4, atol=1e-4)

    print("KERNEL_OK")
</pallas_src>

<mosaic_0001>
module attributes {stable_mosaic.version = 11 : i64} {
  func.func @transformer_layer_kernel(%arg0: memref<16x32xf32, #tpu.memory_space<vmem>>, %arg1: memref<16x16xf32, #tpu.memory_space<vmem>>, %arg2: memref<32x64xf32, #tpu.memory_space<vmem>>, %arg3: memref<32x64xf32, #tpu.memory_space<vmem>>, %arg4: memref<1x64xf32, #tpu.memory_space<vmem>>, %arg5: memref<32x32xf32, #tpu.memory_space<vmem>>, %arg6: memref<32x128xf32, #tpu.memory_space<vmem>>, %arg7: memref<64x32xf32, #tpu.memory_space<vmem>>, %arg8: memref<2x32xf32, #tpu.memory_space<vmem>>, %arg9: memref<16x32xf32, #tpu.memory_space<vmem>>, %arg10: memref<16x32xf32, #tpu.memory_space<vmem>>) attributes {dimension_semantics = [], scalar_prefetch = 0 : i64, scratch_operands = 1 : i64, tpu.core_type = #tpu.core_type<tc>} {
    %c0 = arith.constant 0 : index
    %c0_0 = arith.constant 0 : index
    %0 = vector.load %arg0[%c0, %c0_0] : memref<16x32xf32, #tpu.memory_space<vmem>>, vector<16x32xf32>
    %c0_1 = arith.constant 0 : index
    %c0_2 = arith.constant 0 : index
    %1 = vector.load %arg8[%c0_1, %c0_2] : memref<2x32xf32, #tpu.memory_space<vmem>>, vector<2x32xf32>
    %2 = vector.extract_strided_slice %1 {offsets = [0, 0], sizes = [1, 32], strides = [1, 1]} : vector<2x32xf32> to vector<1x32xf32>
    %3 = arith.mulf %0, %0 : vector<16x32xf32>
    %cst = arith.constant dense<0.000000e+00> : vector<16xf32>
    %4 = vector.multi_reduction <add>, %3, %cst [1] : vector<16x32xf32> to vector<16xf32>
    %5 = vector.shape_cast %4 : vector<16xf32> to vector<16x1xf32>
    %cst_3 = arith.constant 3.200000e+01 : f32
    %6 = vector.broadcast %cst_3 : f32 to vector<16x1xf32>
    %7 = arith.divf %5, %6 : vector<16x1xf32>
    %cst_4 = arith.constant 9.99999974E-6 : f32
    %8 = vector.broadcast %cst_4 : f32 to vector<16x1xf32>
    %9 = arith.addf %7, %8 : vector<16x1xf32>
    %10 = math.rsqrt %9 : vector<16x1xf32>
    %11 = vector.broadcast %10 : vector<16x1xf32> to vector<16x32xf32>
    %12 = arith.mulf %0, %11 : vector<16x32xf32>
    %13 = vector.broadcast %2 : vector<1x32xf32> to vector<16x32xf32>
    %14 = arith.mulf %13, %12 : vector<16x32xf32>
    %c0_5 = arith.constant 0 : index
    %c0_6 = arith.constant 0 : index
    %15 = vector.load %arg3[%c0_5, %c0_6] : memref<32x64xf32, #tpu.memory_space<vmem>>, vector<32x64xf32>
    %cst_7 = arith.constant dense<0.000000e+00> : vector<16x64xf32>
    %16 = tpu.matmul %14, %15, %cst_7 {dimension_numbers = #tpu.dot_dimension_numbers<[1], [0], [0], [1], [0, 0, 1, 1], [], []>} : vector<16x32xf32>, vector<32x64xf32>, vector<16x64xf32> -> vector<16x64xf32>
    %c0_8 = arith.constant 0 : index
    %c0_9 = arith.constant 0 : index
    %17 = vector.load %arg4[%c0_8, %c0_9] : memref<1x64xf32, #tpu.memory_space<vmem>>, vector<1x64xf32>
    %18 = vector.broadcast %17 : vector<1x64xf32> to vector<16x64xf32>
    %19 = arith.addf %16, %18 : vector<16x64xf32>
    %20 = tpu.iota {dimensions = array<i32: 1>} : vector<16x64xi32>
    %c1_i32 = arith.constant 1 : i32
    %21 = vector.broadcast %c1_i32 : i32 to vector<16x64xi32>
    %22 = arith.xori %20, %21 : vector<16x64xi32>
    %23 = arith.sitofp %22 : vector<16x64xi32> to vector<16x64xf32>
    %c1_i32_10 = arith.constant 1 : i32
    %24 = tpu.dynamic_rotate %19 by %c1_i32_10 dim 1 : vector<16x64xf32>, i32 -> vector<16x64xf32>
    %c63_i32 = arith.constant 63 : i32
    %25 = tpu.dynamic_rotate %19 by %c63_i32 dim 1 : vector<16x64xf32>, i32 -> vector<16x64xf32>
    %26 = arith.sitofp %20 : vector<16x64xi32> to vector<16x64xf32>
    %c1_i32_11 = arith.constant 1 : i32
    %27 = tpu.dynamic_rotate %26 by %c1_i32_11 dim 1 : vector<16x64xf32>, i32 -> vector<16x64xf32>
    %28 = arith.cmpf oeq, %27, %23 : vector<16x64xf32>
    %29 = arith.select %28, %24, %25 : vector<16x64xi1>, vector<16x64xf32>
    %c0_12 = arith.constant 0 : index
    %c0_13 = arith.constant 0 : index
    %30 = vector.load %arg2[%c0_12, %c0_13] : memref<32x64xf32, #tpu.memory_space<vmem>>, vector<16x64xf32>
    %c16 = arith.constant 16 : index
    %c0_14 = arith.constant 0 : index
    %31 = vector.load %arg2[%c16, %c0_14] : memref<32x64xf32, #tpu.memory_space<vmem>>, vector<16x64xf32>
    %32 = arith.mulf %19, %30 : vector<16x64xf32>
    %33 = arith.mulf %29, %31 : vector<16x64xf32>
    %34 = arith.addf %32, %33 : vector<16x64xf32>
    %35 = vector.extract_strided_slice %34 {offsets = [0, 0], sizes = [16, 32], strides = [1, 1]} : vector<16x64xf32> to vector<16x32xf32>
    %36 = vector.extract_strided_slice %34 {offsets = [0, 32], sizes = [16, 16], strides = [1, 1]} : vector<16x64xf32> to vector<16x16xf32>
    %37 = vector.extract_strided_slice %34 {offsets = [0, 48], sizes = [16, 16], strides = [1, 1]} : vector<16x64xf32> to vector<16x16xf32>
    %c0_15 = arith.constant 0 : index
    %c0_16 = arith.constant 0 : index
    %38 = vector.load %arg1[%c0_15, %c0_16] : memref<16x16xf32, #tpu.memory_space<vmem>>, vector<16x16xf32>
    %39 = vector.extract_strided_slice %35 {offsets = [0, 0], sizes = [16, 8], strides = [1, 1]} : vector<16x32xf32> to vector<16x8xf32>
    %40 = vector.extract_strided_slice %36 {offsets = [0, 0], sizes = [16, 8], strides = [1, 1]} : vector<16x16xf32> to vector<16x8xf32>
    %cst_17 = arith.constant dense<0.000000e+00> : vector<16x16xf32>
    %41 = tpu.matmul %39, %40, %cst_17 {dimension_numbers = #tpu.dot_dimension_numbers<[1], [1], [0], [0], [0, 0, 1, 0], [], []>} : vector<16x8xf32>, vector<16x8xf32>, vector<16x16xf32> -> vector<16x16xf32>
    %42 = arith.addf %41, %38 : vector<16x16xf32>
    %43 = vector.extract_strided_slice %35 {offsets = [0, 8], sizes = [16, 8], strides = [1, 1]} : vector<16x32xf32> to vector<16x8xf32>
    %44 = vector.extract_strided_slice %36 {offsets = [0, 0], sizes = [16, 8], strides = [1, 1]} : vector<16x16xf32> to vector<16x8xf32>
    %cst_18 = arith.constant dense<0.000000e+00> : vector<16x16xf32>
    %45 = tpu.matmul %43, %44, %cst_18 {dimension_numbers = #tpu.dot_dimension_numbers<[1], [1], [0], [0], [0, 0, 1, 0], [], []>} : vector<16x8xf32>, vector<16x8xf32>, vector<16x16xf32> -> vector<16x16xf32>
    %46 = arith.addf %45, %38 : vector<16x16xf32>
    %47 = vector.extract_strided_slice %35 {offsets = [0, 16], sizes = [16, 8], strides = [1, 1]} : vector<16x32xf32> to vector<16x8xf32>
    %48 = vector.extract_strided_slice %36 {offsets = [0, 8], sizes = [16, 8], strides = [1, 1]} : vector<16x16xf32> to vector<16x8xf32>
    %cst_19 = arith.constant dense<0.000000e+00> : vector<16x16xf32>
    %49 = tpu.matmul %47, %48, %cst_19 {dimension_numbers = #tpu.dot_dimension_numbers<[1], [1], [0], [0], [0, 0, 1, 0], [], []>} : vector<16x8xf32>, vector<16x8xf32>, vector<16x16xf32> -> vector<16x16xf32>
    %50 = arith.addf %49, %38 : vector<16x16xf32>
    %51 = vector.extract_strided_slice %35 {offsets = [0, 24], sizes = [16, 8], strides = [1, 1]} : vector<16x32xf32> to vector<16x8xf32>
    %52 = vector.extract_strided_slice %36 {offsets = [0, 8], sizes = [16, 8], strides = [1, 1]} : vector<16x16xf32> to vector<16x8xf32>
    %cst_20 = arith.constant dense<0.000000e+00> : vector<16x16xf32>
    %53 = tpu.matmul %51, %52, %cst_20 {dimension_numbers = #tpu.dot_dimension_numbers<[1], [1], [0], [0], [0, 0, 1, 0], [], []>} : vector<16x8xf32>, vector<16x8xf32>, vector<16x16xf32> -> vector<16x16xf32>
    %54 = arith.addf %53, %38 : vector<16x16xf32>
    %55 = tpu.concatenate %42, %46, %50, %54 in 0 : vector<16x16xf32>, vector<16x16xf32>, vector<16x16xf32>, vector<16x16xf32> -> vector<64x16xf32>
    %cst_21 = arith.constant dense<0xFF800000> : vector<64xf32>
    %56 = vector.multi_reduction <maximumf>, %55, %cst_21 [1] : vector<64x16xf32> to vector<64xf32>
    %57 = vector.shape_cast %56 : vector<64xf32> to vector<64x1xf32>
    %58 = vector.broadcast %57 : vector<64x1xf32> to vector<64x16xf32>
    %59 = arith.subf %55, %58 : vector<64x16xf32>
    %60 = math.exp %59 : vector<64x16xf32>
    %cst_22 = arith.constant dense<0.000000e+00> : vector<64xf32>
    %61 = vector.multi_reduction <add>, %60, %cst_22 [1] : vector<64x16xf32> to vector<64xf32>
    %62 = vector.shape_cast %61 : vector<64xf32> to vector<64x1xf32>
    %63 = vector.broadcast %62 : vector<64x1xf32> to vector<64x16xf32>
    %64 = arith.divf %60, %63 : vector<64x16xf32>
    %65 = vector.extract_strided_slice %64 {offsets = [0, 0], sizes = [16, 16], strides = [1, 1]} : vector<64x16xf32> to vector<16x16xf32>
    %66 = vector.extract_strided_slice %37 {offsets = [0, 0], sizes = [16, 8], strides = [1, 1]} : vector<16x16xf32> to vector<16x8xf32>
    %cst_23 = arith.constant dense<0.000000e+00> : vector<16x8xf32>
    %67 = tpu.matmul %65, %66, %cst_23 {dimension_numbers = #tpu.dot_dimension_numbers<[1], [0], [0], [1], [0, 0, 1, 1], [], []>} : vector<16x16xf32>, vector<16x8xf32>, vector<16x8xf32> -> vector<16x8xf32>
    %c0_24 = arith.constant 0 : index
    %c0_25 = arith.constant 0 : index
    %68 = vector.load %arg10[%c0_24, %c0_25] : memref<16x32xf32, #tpu.memory_space<vmem>>, vector<16x8xf32>
    tpu.vector_store %arg10[%c0_24, %c0_25], %67 {strides = array<i32>} : memref<16x32xf32, #tpu.memory_space<vmem>>, vector<16x8xf32>,
    %69 = vector.extract_strided_slice %64 {offsets = [16, 0], sizes = [16, 16], strides = [1, 1]} : vector<64x16xf32> to vector<16x16xf32>
    %70 = vector.extract_strided_slice %37 {offsets = [0, 0], sizes = [16, 8], strides = [1, 1]} : vector<16x16xf32> to vector<16x8xf32>
    %cst_26 = arith.constant dense<0.000000e+00> : vector<16x8xf32>
    %71 = tpu.matmul %69, %70, %cst_26 {dimension_numbers = #tpu.dot_dimension_numbers<[1], [0], [0], [1], [0, 0, 1, 1], [], []>} : vector<16x16xf32>, vector<16x8xf32>, vector<16x8xf32> -> vector<16x8xf32>
    %c0_27 = arith.constant 0 : index
    %c8 = arith.constant 8 : index
    %72 = vector.load %arg10[%c0_27, %c8] : memref<16x32xf32, #tpu.memory_space<vmem>>, vector<16x8xf32>
    tpu.vector_store %arg10[%c0_27, %c8], %71 {strides = array<i32>} : memref<16x32xf32, #tpu.memory_space<vmem>>, vector<16x8xf32>,
    %73 = vector.extract_strided_slice %64 {offsets = [32, 0], sizes = [16, 16], strides = [1, 1]} : vector<64x16xf32> to vector<16x16xf32>
    %74 = vector.extract_strided_slice %37 {offsets = [0, 8], sizes = [16, 8], strides = [1, 1]} : vector<16x16xf32> to vector<16x8xf32>
    %cst_28 = arith.constant dense<0.000000e+00> : vector<16x8xf32>
    %75 = tpu.matmul %73, %74, %cst_28 {dimension_numbers = #tpu.dot_dimension_numbers<[1], [0], [0], [1], [0, 0, 1, 1], [], []>} : vector<16x16xf32>, vector<16x8xf32>, vector<16x8xf32> -> vector<16x8xf32>
    %c0_29 = arith.constant 0 : index
    %c16_30 = arith.constant 16 : index
    %76 = vector.load %arg10[%c0_29, %c16_30] : memref<16x32xf32, #tpu.memory_space<vmem>>, vector<16x8xf32>
    tpu.vector_store %arg10[%c0_29, %c16_30], %75 {strides = array<i32>} : memref<16x32xf32, #tpu.memory_space<vmem>>, vector<16x8xf32>,
    %77 = vector.extract_strided_slice %64 {offsets = [48, 0], sizes = [16, 16], strides = [1, 1]} : vector<64x16xf32> to vector<16x16xf32>
    %78 = vector.extract_strided_slice %37 {offsets = [0, 8], sizes = [16, 8], strides = [1, 1]} : vector<16x16xf32> to vector<16x8xf32>
    %cst_31 = arith.constant dense<0.000000e+00> : vector<16x8xf32>
    %79 = tpu.matmul %77, %78, %cst_31 {dimension_numbers = #tpu.dot_dimension_numbers<[1], [0], [0], [1], [0, 0, 1, 1], [], []>} : vector<16x16xf32>, vector<16x8xf32>, vector<16x8xf32> -> vector<16x8xf32>
    %c0_32 = arith.constant 0 : index
    %c24 = arith.constant 24 : index
    %80 = vector.load %arg10[%c0_32, %c24] : memref<16x32xf32, #tpu.memory_space<vmem>>, vector<16x8xf32>
    tpu.vector_store %arg10[%c0_32, %c24], %79 {strides = array<i32>} : memref<16x32xf32, #tpu.memory_space<vmem>>, vector<16x8xf32>,
    %c0_33 = arith.constant 0 : index
    %c0_34 = arith.constant 0 : index
    %81 = vector.load %arg10[%c0_33, %c0_34] : memref<16x32xf32, #tpu.memory_space<vmem>>, vector<16x32xf32>
    %c0_35 = arith.constant 0 : index
    %c0_36 = arith.constant 0 : index
    %82 = vector.load %arg5[%c0_35, %c0_36] : memref<32x32xf32, #tpu.memory_space<vmem>>, vector<32x32xf32>
    %cst_37 = arith.constant dense<0.000000e+00> : vector<16x32xf32>
    %83 = tpu.matmul %81, %82, %cst_37 {dimension_numbers = #tpu.dot_dimension_numbers<[1], [0], [0], [1], [0, 0, 1, 1], [], []>} : vector<16x32xf32>, vector<32x32xf32>, vector<16x32xf32> -> vector<16x32xf32>
    %84 = arith.addf %0, %83 : vector<16x32xf32>
    %85 = vector.extract_strided_slice %1 {offsets = [1, 0], sizes = [1, 32], strides = [1, 1]} : vector<2x32xf32> to vector<1x32xf32>
    %86 = arith.mulf %84, %84 : vector<16x32xf32>
    %cst_38 = arith.constant dense<0.000000e+00> : vector<16xf32>
    %87 = vector.multi_reduction <add>, %86, %cst_38 [1] : vector<16x32xf32> to vector<16xf32>
    %88 = vector.shape_cast %87 : vector<16xf32> to vector<16x1xf32>
    %cst_39 = arith.constant 3.200000e+01 : f32
    %89 = vector.broadcast %cst_39 : f32 to vector<16x1xf32>
    %90 = arith.divf %88, %89 : vector<16x1xf32>
    %cst_40 = arith.constant 9.99999974E-6 : f32
    %91 = vector.broadcast %cst_40 : f32 to vector<16x1xf32>
    %92 = arith.addf %90, %91 : vector<16x1xf32>
    %93 = math.rsqrt %92 : vector<16x1xf32>
    %94 = vector.broadcast %93 : vector<16x1xf32> to vector<16x32xf32>
    %95 = arith.mulf %84, %94 : vector<16x32xf32>
    %96 = vector.broadcast %85 : vector<1x32xf32> to vector<16x32xf32>
    %97 = arith.mulf %96, %95 : vector<16x32xf32>
    %c0_41 = arith.constant 0 : index
    %c0_42 = arith.constant 0 : index
    %98 = vector.load %arg6[%c0_41, %c0_42] : memref<32x128xf32, #tpu.memory_space<vmem>>, vector<32x128xf32>
    %cst_43 = arith.constant dense<0.000000e+00> : vector<16x128xf32>
    %99 = tpu.matmul %97, %98, %cst_43 {dimension_numbers = #tpu.dot_dimension_numbers<[1], [0], [0], [1], [0, 0, 1, 1], [], []>} : vector<16x32xf32>, vector<32x128xf32>, vector<16x128xf32> -> vector<16x128xf32>
    %100 = vector.extract_strided_slice %99 {offsets = [0, 0], sizes = [16, 64], strides = [1, 1]} : vector<16x128xf32> to vector<16x64xf32>
    %101 = vector.extract_strided_slice %99 {offsets = [0, 64], sizes = [16, 64], strides = [1, 1]} : vector<16x128xf32> to vector<16x64xf32>
    %102 = arith.negf %100 : vector<16x64xf32>
    %103 = math.exp %102 : vector<16x64xf32>
    %cst_44 = arith.constant 1.000000e+00 : f32
    %104 = vector.broadcast %cst_44 : f32 to vector<16x64xf32>
    %105 = arith.addf %104, %103 : vector<16x64xf32>
    %106 = arith.divf %104, %105 : vector<16x64xf32>
    %107 = arith.mulf %100, %106 : vector<16x64xf32>
    %108 = arith.mulf %107, %101 : vector<16x64xf32>
    %c0_45 = arith.constant 0 : index
    %c0_46 = arith.constant 0 : index
    %109 = vector.load %arg7[%c0_45, %c0_46] : memref<64x32xf32, #tpu.memory_space<vmem>>, vector<64x32xf32>
    %cst_47 = arith.constant dense<0.000000e+00> : vector<16x32xf32>
    %110 = tpu.matmul %108, %109, %cst_47 {dimension_numbers = #tpu.dot_dimension_numbers<[1], [0], [0], [1], [0, 0, 1, 1], [], []>} : vector<16x64xf32>, vector<64x32xf32>, vector<16x32xf32> -> vector<16x32xf32>
    %111 = arith.addf %84, %110 : vector<16x32xf32>
    %c0_48 = arith.constant 0 : index
    %c0_49 = arith.constant 0 : index
    %112 = vector.load %arg9[%c0_48, %c0_49] : memref<16x32xf32, #tpu.memory_space<vmem>>, vector<16x32xf32>
    tpu.vector_store %arg9[%c0_48, %c0_49], %111 {strides = array<i32>} : memref<16x32xf32, #tpu.memory_space<vmem>>, vector<16x32xf32>,
    return
  }
}

</mosaic_0001>

<bundles_post_ra>
// kernel: tpu_custom_call.1
= control target key start
LH: loop header
LB: loop body
LE: loop exit
PB: predicated region body
PF: predicated region fallthrough
CT: control target
= control target key end

     0   :  { %14 = vsyncpa [#allocation4], 0  ;;  %s2195_s0 = inlined_call_operand.hbm [shape: f32[16,32], index: 0, kind: input, shape index: {}]   ;;  %s2196_s1 = inlined_call_operand.hbm [shape: f32[16,16], index: 1, kind: input, shape index: {}]   ;;  %s2197_s2 = inlined_call_operand.vmem [shape: f32[32,64], index: 2, kind: input, shape index: {}]   ;;  %s2198_s3 = inlined_call_operand.vmem [shape: f32[32,64], index: 3, kind: input, shape index: {}]   ;;  %s2199_s4 = inlined_call_operand.vmem [shape: f32[1,64], index: 4, kind: input, shape index: {}]   ;;  %s2200_s5 = inlined_call_operand.vmem [shape: f32[32,32], index: 5, kind: input, shape index: {}]   ;;  %s2201_s6 = inlined_call_operand.hbm [shape: f32[32,128], index: 6, kind: input, shape index: {}]   ;;  %s2202_s7 = inlined_call_operand.vmem [shape: f32[64,32], index: 7, kind: input, shape index: {}]   ;;  %s2203_s8 = inlined_call_operand.vmem [shape: f32[2,32], index: 8, kind: input, shape index: {}]   ;;  %s2204_s9 = inlined_call_operand.hbm [shape: f32[16,32], index: 9, kind: output, shape index: {}]  }
   0x1   :  { %15 = vsyncpa [#allocation7], 0 }
   0x2   :  { %16 = vsyncpa [#allocation5], 0  ;;  %s1863_s30 = smov [#allocation6]   ;;  %s1864_s11 = smov [#allocation3]  }
   0x3   :  { %s34_s10 = sshll.u32 %s1863_s30, 4  ;;  %s22_s12 = sshll.u32 %s1864_s11, 4  ;;  %s35_s10 = int_to_ptr.vmem [resolvable:$true] %s34_s10  ;;  %s1932_s12 = int_to_ptr.vmem [resolvable:$true] %s22_s12 }
   0x4   :  { %s1769_s15 = scalar_lea.hbm %s2196_s1, 256 }
   0x5   :  { %p1770_p0 = scmp.ne.s32.totalorder %s2196_s1, %s1769_s15  ;;  %p1773_p1 = scmp.lt.u32.totalorder %s1769_s15, %s2196_s1 }
   0x7   :  { %p1775_p2 = pnand %p1773_p1, %p1770_p0 }
   0x9   :  { %1778 = shalt.err (!%p1775_p2)
}
   0xa   :  { %s1779_s20 = scalar_lea.vmem %s35_s10, 256  ;;  %p1784_p4 = scmp.lt.s32.totalorder %s35_s10, %s35_s10 }
   0xb   :  { %p1780_p3 = scmp.ne.s32.totalorder %s35_s10, %s1779_s20  ;;  %p1785_p5 = scmp.lt.s32.totalorder %s1779_s20, %s1779_s20 }
   0xd   :  { %p1786_p6 = por %p1785_p5, %p1784_p4 }
   0xf   :  { %p1787_p7 = pnand %p1786_p6, %p1780_p3 }
  0x11   :  { %1790 = shalt.err (!%p1787_p7)
}
  0x12   :  { %s1865_s21 = smov 128   ;;  %s1866_s22 = smov 8  }
  0x13   :  { %40 = dma.hbm_to_vmem [thread:$0]  %s2196_s1, 256, %s35_s10, [#allocation7], %s1865_s21, %s1865_s21, %s1866_s22  }
  0x14   :  { %s1791_s27 = scalar_lea.hbm %s2195_s0, 256 }
  0x15   :  { %p1792_p8 = scmp.ne.s32.totalorder %s2195_s0, %s1791_s27  ;;  %p1795_p9 = scmp.lt.u32.totalorder %s1791_s27, %s2195_s0 }
  0x17   :  { %p1797_p10 = pnand %p1795_p9, %p1792_p8 }
  0x19   :  { %1800 = shalt.err (!%p1797_p10)
}
  0x1a   :  { %s1801_s13 = scalar_lea.vmem %s1932_s12, 256  ;;  %p1806_p12 = scmp.lt.s32.totalorder %s1932_s12, %s1932_s12 }
  0x1b   :  { %p1802_p11 = scmp.ne.s32.totalorder %s1932_s12, %s1801_s13  ;;  %p1807_p13 = scmp.lt.s32.totalorder %s1801_s13, %s1801_s13 }
  0x1d   :  { %p1808_p0 = por %p1807_p13, %p1806_p12 }
  0x1f   :  { %p1809_p1 = pnand %p1808_p0, %p1802_p11 }
  0x21   :  { %1812 = shalt.err (!%p1809_p1)
}
  0x22   :  { %28 = dma.hbm_to_vmem [thread:$0]  %s2195_s0, 256, %s1932_s12, [#allocation4], %s1865_s21, %s1865_s21, %s1866_s22  }
  0x23   :  { %s1867_s14 = smov [#allocation8]   ;;  %s1813_s18 = scalar_lea.hbm %s2201_s6, 512 }
  0x24   :  { %s54_s15 = sshll.u32 %s1867_s14, 4  ;;  %p1814_p2 = scmp.ne.s32.totalorder %s2201_s6, %s1813_s18  ;;  %s55_s15 = int_to_ptr.vmem [resolvable:$true] %s54_s15 }
  0x25   :  { %p1817_p3 = scmp.lt.u32.totalorder %s1813_s18, %s2201_s6 }
  0x27   :  { %p1819_p4 = pnand %p1817_p3, %p1814_p2 }
  0x29   :  { %1822 = shalt.err (!%p1819_p4)
}
  0x2a   :  { %s1823_s25 = scalar_lea.vmem %s55_s15, 512  ;;  %p1828_p6 = scmp.lt.s32.totalorder %s55_s15, %s55_s15 }
  0x2b   :  { %p1824_p5 = scmp.ne.s32.totalorder %s55_s15, %s1823_s25  ;;  %p1829_p7 = scmp.lt.s32.totalorder %s1823_s25, %s1823_s25 }
  0x2d   :  { %p1830_p8 = por %p1829_p7, %p1828_p6 }
  0x2f   :  { %p1831_p9 = pnand %p1830_p8, %p1824_p5 }
  0x31   :  { %1834 = shalt.err (!%p1831_p9)
}
  0x32   :  { %60 = dma.hbm_to_vmem [thread:$0]  %s2201_s6, 512, %s55_s15, [#allocation7], %s1865_s21, %s1865_s21, %s1866_s22  }
  0x33   :  { %1857 = dma.done.wait [#allocation4], 256  }
  0x34   :  { %1858 = vsyncadd [#allocation4], 4294967040 }
  0x35   :  { %1859 = dma.done.wait [#allocation7], 768  }
  0x36   :  { %1860 = vsyncadd [#allocation7], 4294966528  ;;  %v1984_v0 = vld [vmem:[#allocation3] sm:$0xff]  ;;  %vm79_vm0 = vcmask 261120   ;;  %v1986_v1 = vld [vmem:[#allocation3 + $0x8] sm:$0xff]  ;;  %v95_v12 = vlaneseq  ;;  %vm197_vm1 = vcmask 1048064  }
  0x37   :  { %v77_v2 = vmul.f32 %v1984_v0, %v1984_v0  ;;  %v78_v3 = vmul.f32 %v1986_v1, %v1986_v1  ;;  %v101_v6 = vld [vmem:[%s2198_s3] sm:$0xff]  ;;  %v102_v7 = vld [vmem:[%s2198_s3 + $0x8] sm:$0xff]  ;;  %v103_v8 = vld [vmem:[%s2198_s3 + $0x10] sm:$0xff]  ;;  %s1869_s17 = smov 63   ;;  %s1871_s20 = smov 65   ;;  %vm266_vm3 = vcmask 64512  }
  0x38   :  { %v1602_v9 = vpack.c.bf16 %v102_v7, %v101_v6  ;;  %v104_v10 = vld [vmem:[%s2198_s3 + $0x18] sm:$0xff]  ;;  %v96_v13 = vshrl.u32 %v95_v12, 7  ;;  %v76_v15 = vld [vmem:[%s2203_s8] sm:$0x3]  ;;  %v194_v31 = vand.u32 127, %v95_v12  ;;  %s1868_s3 = smov 64   ;;  %vm2049_vm4 = vmpackc.low %vm266_vm3, %vm266_vm3 }
  0x39   :  { %v80_v4 = vsel %vm79_vm0, %v77_v2, 0.0  ;;  %v83_v5 = vsel %vm79_vm0, %v78_v3, 0.0  ;;  %v1606_v11 = vpack.c.bf16 %v104_v10, %v103_v8  ;;  %v1399_v33 = vld [vmem:[%s2199_s4] ss:$0 sm:$0xff]  ;;  %v234_v38 = vld [vmem:[%s2197_s2 + $0x10] sm:$0xff]  ;;  %s1870_s4 = smov 62  }
  0x3a   :  { %81 = vadd.xlane.f32.xlu0 %v80_v4  ;;  %1603 = vmatprep.subr.bf16.mxu1 %v1602_v9  ;;  %v1174_v14 = vsub.s32 1, %v96_v13  ;;  %v97_v23 = vsub.s32 0, %v96_v13  ;;  %v210_v32 = vcvt.s32.f32 %v194_v31  ;;  %v195_v44 = vxor.u32 1, %v194_v31  ;;  %v235_v51 = vld [vmem:[%s2197_s2 + $0x18] sm:$0xff]  ;;  %v232_v63 = vld [vmem:[%s2197_s2] sm:$0xff]  ;;  %v233_v3 = vld [vmem:[%s2197_s2 + $0x8] sm:$0xff] }
  0x3b   :  { %1605 = vmatpush3.bf16.msra.mxu1 %v1602_v9  ;;  %s1872_s12 = smov 88   ;;  %s1873_s6 = smov 96   ;;  %vm607_vm5 = vcmask 130048   ;;  %v258_v31 = vld [vmem:[#allocation6] sm:$0xff]  ;;  %vm874_vm6 = vcmask 130112   ;;  %vm972_vm7 = vcmask 195712  }
  0x3c   :  { %1607 = vmatprep.subr.bf16.mxu1 %v1606_v11  ;;  %v2009_v16 = vrot.slane %v76_v15, %v1174_v14  ;;  %v98_v24 = vrot.slane %v76_v15, %v97_v23  ;;  %v196_v46 = vcvt.s32.f32 %v195_v44  ;;  %s1874_s26 = smov 120   ;;  %s1875_s2 = smov 112   ;;  %vm1064_vm8 = vcmask 261312  }
  0x3d   :  { %s1876_s27 = smov 104   ;;  %s1877_s28 = smov 80   ;;  %vm1295_vm9 = vcmask 523264  }
  0x3e   :  { %84 = vadd.xlane.f32.xlu0 %v83_v5  ;;  %s1878_s29 = smov 72   ;;  %s1879_s30 = smov 16  }
  0x3f   :  { %1609 = vmatpush3.bf16.msra.mxu1 %v1606_v11 }
  0x54   :  { %211 = vrot.lane.b32.xlu0 %v210_v32, %s1868_s3 }
  0x58   :  { %240 = vrot.lane.b32.xlu0 %v234_v38, %s1869_s17 }
  0xc7   :  { %v82_v17 = vpop.xlane.xlu0 %81 }
  0xc8   :  { %v87_v18 = vmul.f32 0.03125, %v82_v17 }
  0xca   :  { %v89_v19 = vadd.f32 1e-05, %v87_v18 }
  0xcb   :  { %v85_v20 = vpop.xlane.xlu0 %84 }
  0xcc   :  { %1721 = vrsqrt.f32 %v89_v19  ;;  %v88_v21 = vmul.f32 0.03125, %v85_v20 }
  0xce   :  { %v90_v22 = vadd.f32 1e-05, %v88_v21 }
  0xcf   :  { %v212_v42 = vpop.permute.xlu0 %211 }
  0xd0   :  { %1723 = vrsqrt.f32 %v90_v22  ;;  %v213_v45 = vsel %vm197_vm1, %v212_v42, %v210_v32 }
  0xd3   :  { %v241_v56 = vpop.permute.xlu0 %240 }
  0xd6   :  { %v1722_v25 = vpop.eup %1721 }
  0xd7   :  { %v93_v26 = vmul.f32 %v1722_v25, %v1984_v0 }
  0xd9   :  { %v99_v27 = vmul.f32 %v98_v24, %v93_v26  ;;  %v259_v26 = vld [vmem:[#allocation6 + $0x8] sm:$0xff] }
  0xda   :  { %v1724_v28 = vpop.eup %1723 }
  0xdb   :  { %v94_v29 = vmul.f32 %v1724_v28, %v1986_v1  ;;  %1502 = vmatprep.mubr.msk.f32.mxu1 %vm79_vm0, %v99_v27 }
  0xdd   :  { %v100_v30 = vmul.f32 %v98_v24, %v94_v29 }
  0xdf   :  { %1503 = vmatmul.mubr.msk.f32.vlgmr.msra.gmra.mrb[0].mxu1 %vm79_vm0, %v100_v30 }
 0x1b2   :  { %v1504_v34 = vpop.f32.mrb[0].mxu1 }
 0x1b3   :  { %v184_v35 = vpop.f32.mrb[1].mxu1  ;;  %v190_v37 = vadd.f32 %v1504_v34, %v1399_v33 }
 0x1b4   :  { %v185_v36 = vadd.f32 %v1399_v33, %v184_v35 }
 0x1b5   :  { %v237_v6 = vmul.f32 %v233_v3, %v190_v37 }
 0x1b6   :  { %198 = vrot.lane.b32.xlu1 %v185_v36, %s1868_s3  ;;  %v236_v2 = vmul.f32 %v232_v63, %v185_v36 }
 0x1ba   :  { %201 = vrot.lane.b32.xlu1 %v190_v37, %s1868_s3 }
 0x228   :  { %v199_v39 = vpop.permute.xlu1 %198 }
 0x229   :  { %v200_v40 = vsel %vm197_vm1, %v199_v39, %v185_v36 }
 0x22a   :  { %204 = vrot.lane.b32.xlu1 %v200_v40, %s1868_s3 }
 0x22c   :  { %v202_v41 = vpop.permute.xlu1 %201 }
 0x22d   :  { %v203_v43 = vsel %vm197_vm1, %v202_v41, %v190_v37 }
 0x22e   :  { %206 = vrot.lane.b32.xlu1 %v203_v43, %s1868_s3 }
 0x232   :  { %214 = vrot.lane.b32.xlu1 %v213_v45, %s1868_s3 }
 0x236   :  { %218 = vrot.lane.b32.xlu1 %v196_v46, %s1869_s17 }
 0x29c   :  { %v205_v47 = vpop.permute.xlu1 %204 }
 0x29d   :  { %v208_v50 = vsel %vm197_vm1, %v205_v47, %v185_v36 }
 0x2a0   :  { %v207_v48 = vpop.permute.xlu1 %206 }
 0x2a1   :  { %v209_v49 = vsel %vm197_vm1, %v207_v48, %v190_v37 }
 0x2a2   :  { %226 = vrot.lane.b32.xlu1 %v209_v49, %s1870_s4 }
 0x2a4   :  { %v215_v52 = vpop.permute.xlu1 %214 }
 0x2a5   :  { %v216_v55 = vsel %vm197_vm1, %v215_v52, %v210_v32 }
 0x2a6   :  { %224 = vrot.lane.b32.xlu1 %v208_v50, %s1870_s4 }
 0x2a8   :  { %v219_v53 = vpop.permute.xlu1 %218 }
 0x2a9   :  { %vm221_vm2 = vcmp.eq.f32.partialorder %v216_v55, %v219_v53 }
 0x2aa   :  { %242 = vrot.lane.b32.xlu1 %v235_v51, %s1869_s17  ;;  %s1880_s17 = smov 24  }
 0x314   :  { %v227_v54 = vpop.permute.xlu1 %226 }
 0x315   :  { %v231_v60 = vsel %vm221_vm2, %v209_v49, %v227_v54 }
 0x318   :  { %v225_v57 = vpop.permute.xlu1 %224 }
 0x319   :  { %v230_v58 = vsel %vm221_vm2, %v208_v50, %v225_v57 }
 0x31a   :  { %v246_v59 = vmul.f32 %v241_v56, %v230_v58 }
 0x31c   :  { %v243_v61 = vpop.permute.xlu1 %242  ;;  %250 = vrot.lane.b32.xlu0 %v246_v59, %s1871_s20 }
 0x31d   :  { %v247_v62 = vmul.f32 %v243_v61, %v231_v60 }
 0x31f   :  { %252 = vrot.lane.b32.xlu1 %v247_v62, %s1871_s20 }
 0x38e   :  { %v251_v4 = vpop.permute.xlu0 %250 }
 0x38f   :  { %v256_v5 = vadd.f32 %v251_v4, %v236_v2 }
 0x391   :  { %v253_v7 = vpop.permute.xlu1 %252  ;;  %1509 = vmatprep.mubr.msk.f32.mxu1 %vm266_vm3, %v256_v5 }
 0x392   :  { %v257_v8 = vadd.f32 %v253_v7, %v237_v6 }
 0x394   :  { %v2043_v9 = vpack.i.bf16 %v257_v8, %v256_v5 }
 0x396   :  { %1707 = vrot.lane.b32.xlu1 %v2043_v9, %s1872_s12  ;;  %1702 = vrot.lane.b32.xlu0 %v2043_v9, %s1873_s6 }
 0x39a   :  { %352 = vrot.lane.b32.xlu1 %v257_v8, %s1874_s26  ;;  %350 = vrot.lane.b32.xlu0 %v256_v5, %s1874_s26 }
 0x39e   :  { %435 = vrot.lane.b32.xlu1 %v257_v8, %s1875_s2  ;;  %433 = vrot.lane.b32.xlu0 %v256_v5, %s1875_s2 }
 0x3a2   :  { %526 = vrot.lane.b32.xlu1 %v257_v8, %s1876_s27  ;;  %524 = vrot.lane.b32.xlu0 %v256_v5, %s1876_s27 }
 0x408   :  { %v1708_v10 = vpop.permute.xlu1 %1707  ;;  %v1703_v11 = vpop.permute.xlu0 %1702 }
 0x409   :  { %v1710_v12 = vunpack.i.h.bf16 %v1708_v10  ;;  %v1709_v13 = vunpack.i.l.bf16 %v1708_v10  ;;  %v1705_v14 = vunpack.i.h.bf16 %v1703_v11  ;;  %v1704_v15 = vunpack.i.l.bf16 %v1703_v11 }
 0x40b   :  { %v1610_v18 = vpack.c.bf16 %v1705_v14, %v1704_v15  ;;  %v1622_v20 = vpack.c.bf16 %v1710_v12, %v1709_v13 }
 0x40c   :  { %v351_v19 = vpop.permute.xlu0 %350  ;;  %v353_v22 = vpop.permute.xlu1 %352 }
 0x40d   :  { %1612 = vmatprep.subr.msk.bf16.mxu1 %vm2049_vm4, %v1610_v18  ;;  %1618 = vmatprep.subr.msk.bf16.mxu0 %vm2049_vm4, %v1610_v18 }
 0x40e   :  { %1516 = vmatprep.mubr.msk.f32.mxu0 %vm266_vm3, %v351_v19  ;;  %1615 = vmatpush3.bf16.xpose.msk.msra.mxu1 %vm2049_vm4, %v1610_v18 }
 0x40f   :  { %1621 = vmatpush3.bf16.xpose.msk.msra.mxu0 %vm2049_vm4, %v1610_v18  ;;  %1624 = vmatprep.subr.msk.bf16.mxu1 %vm2049_vm4, %v1622_v20 }
 0x410   :  { %1630 = vmatprep.subr.msk.bf16.mxu0 %vm2049_vm4, %v1622_v20  ;;  %v434_v21 = vpop.permute.xlu0 %433  ;;  %v436_v24 = vpop.permute.xlu1 %435 }
 0x414   :  { %v525_v23 = vpop.permute.xlu0 %524  ;;  %v527_v25 = vpop.permute.xlu1 %526 }
 0x415   :  { %1510 = vmatmul.mubr.msk.f32.vlgmr.msra.gmra.mrb[2].mxu1 %vm266_vm3, %v257_v8 }
 0x416   :  { %1517 = vmatmul.mubr.msk.f32.vlgmr.msra.gmra.mrb[0].mxu0 %vm266_vm3, %v353_v22  ;;  %1627 = vmatpush3.bf16.xpose.msk.msra.mxu1 %vm2049_vm4, %v1622_v20 }
 0x417   :  { %1523 = vmatprep.mubr.msk.f32.mxu1 %vm266_vm3, %v434_v21  ;;  %1633 = vmatpush3.bf16.xpose.msk.msra.mxu0 %vm2049_vm4, %v1622_v20 }
 0x418   :  { %1530 = vmatprep.mubr.msk.f32.mxu0 %vm266_vm3, %v525_v23 }
 0x41d   :  { %1524 = vmatmul.mubr.msk.f32.vlgmr.msra.gmra.mrb[4].mxu1 %vm266_vm3, %v436_v24 }
 0x41e   :  { %1531 = vmatmul.mubr.msk.f32.vlgmr.msra.gmra.mrb[2].mxu0 %vm266_vm3, %v527_v25 }
 0x4e8   :  { %v1511_v27 = vpop.f32.mrb[2].mxu1 }
 0x4e9   :  { %v347_v28 = vadd.f32 %v1511_v27, %v259_v26  ;;  %v1518_v29 = vpop.f32.mrb[0].mxu0  ;;  %v341_v30 = vpop.f32.mrb[3].mxu1 }
 0x4ea   :  { %v430_v32 = vadd.f32 %v1518_v29, %v259_v26  ;;  %v424_v33 = vpop.f32.mrb[1].mxu0  ;;  %v342_v35 = vadd.f32 %v341_v30, %v258_v31 }
 0x4eb   :  { %v611_v34 = vsel %vm607_vm5, %v347_v28, -inf  ;;  %v425_v37 = vadd.f32 %v424_v33, %v258_v31 }
 0x4ec   :  { %v617_v36 = vsel %vm607_vm5, %v430_v32, -inf  ;;  %612 = vmax.xlane.f32.xlu1 %v611_v34  ;;  %v608_v39 = vsel %vm607_vm5, %v342_v35, -inf }
 0x4ed   :  { %618 = vmax.xlane.f32.xlu0 %v617_v36  ;;  %v614_v46 = vsel %vm607_vm5, %v425_v37, -inf }
 0x4f0   :  { %v1525_v38 = vpop.f32.mrb[4].mxu1 }
 0x4f1   :  { %v1532_v40 = vpop.f32.mrb[2].mxu0  ;;  %609 = vmax.xlane.f32.xlu0 %v608_v39  ;;  %v515_v41 = vpop.f32.mrb[5].mxu1  ;;  %v521_v44 = vadd.f32 %v1525_v38, %v259_v26 }
 0x4f2   :  { %v516_v42 = vadd.f32 %v515_v41, %v258_v31  ;;  %v598_v43 = vpop.f32.mrb[3].mxu0  ;;  %v604_v48 = vadd.f32 %v1532_v40, %v259_v26 }
 0x4f3   :  { %v599_v45 = vadd.f32 %v598_v43, %v258_v31  ;;  %v623_v49 = vsel %vm607_vm5, %v521_v44, -inf }
 0x4f4   :  { %v620_v47 = vsel %vm607_vm5, %v516_v42, -inf  ;;  %v629_v51 = vsel %vm607_vm5, %v604_v48, -inf }
 0x4f5   :  { %615 = vmax.xlane.f32.xlu0 %v614_v46  ;;  %621 = vmax.xlane.f32.xlu1 %v620_v47  ;;  %v626_v50 = vsel %vm607_vm5, %v599_v45, -inf }
 0x4f9   :  { %624 = vmax.xlane.f32.xlu0 %v623_v49  ;;  %627 = vmax.xlane.f32.xlu1 %v626_v50 }
 0x4fd   :  { %630 = vmax.xlane.f32.xlu0 %v629_v51 }
 0x579   :  { %v613_v52 = vpop.xlane.xlu1 %612 }
 0x57a   :  { %v619_v53 = vpop.xlane.xlu0 %618  ;;  %v633_v54 = vsub.f32 %v347_v28, %v613_v52 }
 0x57b   :  { %v635_v55 = vsub.f32 %v430_v32, %v619_v53 }
 0x57c   :  { %v642_v56 = vmul.f32 1.442695, %v633_v54 }
 0x57d   :  { %v646_v57 = vmul.f32 1.442695, %v635_v55 }
 0x57e   :  { %1725 = vpow2.f32 %v642_v56  ;;  %v610_v58 = vpop.xlane.xlu0 %609 }
 0x57f   :  { %v632_v59 = vsub.f32 %v342_v35, %v610_v58  ;;  %1727 = vpow2.f32 %v646_v57 }
 0x581   :  { %v640_v60 = vmul.f32 1.442695, %v632_v59 }
 0x582   :  { %v616_v61 = vpop.xlane.xlu0 %615  ;;  %v622_v62 = vpop.xlane.xlu1 %621 }
 0x583   :  { %1729 = vpow2.f32 %v640_v60  ;;  %v634_v63 = vsub.f32 %v425_v37, %v616_v61  ;;  %v636_v2 = vsub.f32 %v516_v42, %v622_v62 }
 0x585   :  { %v644_v3 = vmul.f32 1.442695, %v634_v63  ;;  %v648_v4 = vmul.f32 1.442695, %v636_v2 }
 0x586   :  { %v625_v5 = vpop.xlane.xlu0 %624  ;;  %v628_v6 = vpop.xlane.xlu1 %627 }
 0x587   :  { %1731 = vpow2.f32 %v644_v3  ;;  %v637_v7 = vsub.f32 %v521_v44, %v625_v5  ;;  %v638_v8 = vsub.f32 %v599_v45, %v628_v6  ;;  %v1069_v5 = vld [vmem:[%s2200_s5] sm:$0xff]  ;;  %v1070_v6 = vld [vmem:[%s2200_s5 + $0x8] sm:$0xff] }
 0x588   :  { %v2084_v10 = vpop.eup %1725  ;;  %1733 = vpow2.f32 %v648_v4 }
 0x589   :  { %v650_v11 = vmul.f32 1.442695, %v637_v7  ;;  %v652_v12 = vmul.f32 1.442695, %v638_v8  ;;  %v659_v13 = vsel %vm607_vm5, %v2084_v10, 0.0  ;;  %v2088_v14 = vpop.eup %1727  ;;  %v1650_v7 = vpack.c.bf16 %v1070_v6, %v1069_v5 }
 0x58a   :  { %v631_v15 = vpop.xlane.xlu0 %630  ;;  %660 = vadd.xlane.f32.xlu0 %v659_v13  ;;  %v665_v20 = vsel %vm607_vm5, %v2088_v14, 0.0 }
 0x58b   :  { %1735 = vpow2.f32 %v650_v11  ;;  %v639_v17 = vsub.f32 %v604_v48, %v631_v15  ;;  %v1071_v11 = vld [vmem:[%s2200_s5 + $0x10] sm:$0xff] }
 0x58c   :  { %1737 = vpow2.f32 %v652_v12  ;;  %v1072_v12 = vld [vmem:[%s2200_s5 + $0x18] sm:$0xff] }
 0x58d   :  { %v1730_v18 = vpop.eup %1729  ;;  %v654_v19 = vmul.f32 1.442695, %v639_v17  ;;  %v1654_v13 = vpack.c.bf16 %v1072_v12, %v1071_v11 }
 0x58e   :  { %666 = vadd.xlane.f32.xlu0 %v665_v20  ;;  %v656_v21 = vsel %vm607_vm5, %v1730_v18, 0.0 }
 0x58f   :  { %1739 = vpow2.f32 %v654_v19  ;;  %657 = vadd.xlane.f32.xlu1 %v656_v21 }
 0x591   :  { %v1732_v22 = vpop.eup %1731 }
 0x592   :  { %v662_v23 = vsel %vm607_vm5, %v1732_v22, 0.0  ;;  %v1734_v24 = vpop.eup %1733 }
 0x593   :  { %663 = vadd.xlane.f32.xlu1 %v662_v23  ;;  %v668_v26 = vsel %vm607_vm5, %v1734_v24, 0.0 }
 0x595   :  { %v1736_v25 = vpop.eup %1735 }
 0x596   :  { %v671_v27 = vsel %vm607_vm5, %v1736_v25, 0.0  ;;  %v1738_v28 = vpop.eup %1737 }
 0x597   :  { %669 = vadd.xlane.f32.xlu1 %v668_v26  ;;  %672 = vadd.xlane.f32.xlu0 %v671_v27  ;;  %v674_v30 = vsel %vm607_vm5, %v1738_v28, 0.0 }
 0x599   :  { %v2096_v29 = vpop.eup %1739 }
 0x59a   :  { %v677_v31 = vsel %vm607_vm5, %v2096_v29, 0.0 }
 0x59b   :  { %675 = vadd.xlane.f32.xlu1 %v674_v30  ;;  %678 = vadd.xlane.f32.xlu0 %v677_v31 }
 0x5ac   :  { %1712 = vrot.lane.b32.xlu1 %v2043_v9, %s1877_s28 }
 0x5b1   :  { %1717 = vrot.lane.b32.xlu0 %v2043_v9, %s1878_s29 }
 0x617   :  { %v661_v32 = vpop.xlane.xlu0 %660 }
 0x61b   :  { %v667_v34 = vpop.xlane.xlu0 %666 }
 0x61c   :  { %v658_v33 = vpop.xlane.xlu1 %657 }
 0x61d   :  { %1741 = vrcp.f32 %v658_v33  ;;  %v1178_v33 = vld [vmem:[#allocation8] sm:$0xff] }
 0x61e   :  { %1743 = vrcp.f32 %v661_v32 }
 0x620   :  { %v664_v35 = vpop.xlane.xlu1 %663 }
 0x624   :  { %v670_v36 = vpop.xlane.xlu1 %669  ;;  %v673_v37 = vpop.xlane.xlu0 %672 }
 0x625   :  { %1745 = vrcp.f32 %v670_v36 }
 0x626   :  { %1747 = vrcp.f32 %v673_v37 }
 0x627   :  { %v1742_v38 = vpop.eup %1741  ;;  %1749 = vrcp.f32 %v664_v35  ;;  %v1180_v35 = vld [vmem:[#allocation8 + $0x10] sm:$0xff] }
 0x628   :  { %v676_v39 = vpop.xlane.xlu1 %675  ;;  %v679_v40 = vpop.xlane.xlu0 %678  ;;  %v681_v41 = vmul.f32 %v1742_v38, %v1730_v18  ;;  %1751 = vrcp.f32 %v667_v34  ;;  %v1179_v34 = vld [vmem:[#allocation8 + $0x8] sm:$0xff] }
 0x629   :  { %1753 = vrcp.f32 %v676_v39  ;;  %v1744_v47 = vpop.eup %1743 }
 0x62a   :  { %1537 = vmatprep.mubr.msk.f32.mxu1 %vm607_vm5, %v681_v41  ;;  %1755 = vrcp.f32 %v679_v40  ;;  %v683_v54 = vmul.f32 %v1744_v47, %v2084_v10 }
 0x62c   :  { %v1713_v9 = vpop.permute.xlu1 %1712  ;;  %v1718_v42 = vpop.permute.xlu0 %1717 }
 0x62d   :  { %v1715_v43 = vunpack.i.h.bf16 %v1713_v9  ;;  %v1714_v44 = vunpack.i.l.bf16 %v1713_v9  ;;  %v1720_v45 = vunpack.i.h.bf16 %v1718_v42  ;;  %v1719_v46 = vunpack.i.l.bf16 %v1718_v42 }
 0x62f   :  { %v1746_v48 = vpop.eup %1745  ;;  %v1634_v49 = vpack.c.bf16 %v1715_v43, %v1714_v44  ;;  %v1642_v50 = vpack.c.bf16 %v1720_v45, %v1719_v46 }
 0x630   :  { %v1748_v51 = vpop.eup %1747  ;;  %v689_v52 = vmul.f32 %v1746_v48, %v1734_v24  ;;  %v1287_v48 = vld [vmem:[%s2202_s7] sm:$0xff] }
 0x631   :  { %v1750_v53 = vpop.eup %1749  ;;  %1635 = vmatprep.subr.bf16.mxu1 %v1634_v49  ;;  %1643 = vmatprep.subr.bf16.mxu0 %v1642_v50  ;;  %v691_v55 = vmul.f32 %v1748_v51, %v1736_v25 }
 0x632   :  { %1637 = vmatpush3.bf16.msra.mxu1 %v1634_v49  ;;  %1645 = vmatpush3.bf16.msra.mxu0 %v1642_v50  ;;  %v1752_v56 = vpop.eup %1751  ;;  %v685_v57 = vmul.f32 %v1750_v53, %v1732_v22  ;;  %v1291_v53 = vld [vmem:[%s2202_s7 + $0x20] sm:$0xff] }
 0x633   :  { %1551 = vmatprep.mubr.msk.f32.mxu0 %vm607_vm5, %v689_v52  ;;  %1639 = vmatprep.subr.bf16.mxu1 %v1634_v49  ;;  %v1754_v58 = vpop.eup %1753  ;;  %v687_v59 = vmul.f32 %v1752_v56, %v2088_v14  ;;  %v1293_v56 = vld [vmem:[%s2202_s7 + $0x30] sm:$0xff] }
 0x634   :  { %v1756_v60 = vpop.eup %1755  ;;  %v693_v61 = vmul.f32 %v1754_v58, %v1738_v28  ;;  %1651 = vmatprep.subr.bf16.mxu0 %v1650_v7 }
 0x635   :  { %1538 = vmatmul.mubr.msk.f32.vlgmr.msra.gmra.mrb[6].mxu1 %vm607_vm5, %v683_v54  ;;  %1552 = vmatmul.mubr.msk.f32.vlgmr.msra.gmra.mrb[4].mxu0 %vm607_vm5, %v691_v55  ;;  %v695_v62 = vmul.f32 %v1756_v60, %v2096_v29  ;;  %v1292_v54 = vld [vmem:[%s2202_s7 + $0x28] sm:$0xff] }
 0x636   :  { %1641 = vmatpush3.bf16.msra.mxu1 %v1634_v49  ;;  %1544 = vmatprep.mubr.msk.f32.mxu1 %vm607_vm5, %v685_v57  ;;  %v1288_v49 = vld [vmem:[%s2202_s7 + $0x8] sm:$0xff]  ;;  %v1674_v55 = vpack.c.bf16 %v1292_v54, %v1291_v53  ;;  %v1294_v57 = vld [vmem:[%s2202_s7 + $0x38] sm:$0xff] }
 0x637   :  { %1647 = vmatprep.subr.bf16.mxu1 %v1642_v50  ;;  %1653 = vmatpush3.bf16.msra.mxu0 %v1650_v7  ;;  %v1666_v51 = vpack.c.bf16 %v1288_v49, %v1287_v48  ;;  %v1678_v58 = vpack.c.bf16 %v1294_v57, %v1293_v56 }
 0x638   :  { %1655 = vmatprep.subr.bf16.mxu0 %v1654_v13 }
 0x639   :  { %1545 = vmatmul.mubr.msk.f32.vlgmr.msra.gmra.mrb[8].mxu1 %vm607_vm5, %v687_v59 }
 0x63a   :  { %1649 = vmatpush3.bf16.msra.mxu1 %v1642_v50  ;;  %1558 = vmatprep.mubr.msk.f32.mxu1 %vm607_vm5, %v693_v61  ;;  %v1289_v50 = vld [vmem:[%s2202_s7 + $0x10] sm:$0xff] }
 0x63b   :  { %1657 = vmatpush3.bf16.msra.mxu0 %v1654_v13 }
 0x63c   :  { %1667 = vmatprep.subr.bf16.mxu0 %v1666_v51 }
 0x63d   :  { %1559 = vmatmul.mubr.msk.f32.vlgmr.msra.gmra.mrb[10].mxu1 %vm607_vm5, %v695_v62 }
 0x708   :  { %v1539_v63 = vpop.f32.mrb[6].mxu1  ;;  %v1553_v2 = vpop.f32.mrb[4].mxu0 }
 0x709   :  { %784 = vst.msk [vmem:[#allocation2 + $0x8] sm:$0xff] %vm266_vm3, %v1539_v63  ;;  %v774_v3 = vpop.f32.mrb[7].mxu1  ;;  %v955_v4 = vpop.f32.mrb[5].mxu0 }
 0x70a   :  { %783 = vst.msk [vmem:[#allocation2] sm:$0xff] %vm266_vm3, %v774_v3  ;;  %966 = vrot.lane.b32.xlu0 %v955_v4, %s1879_s30 }
 0x70c   :  { %v1546_v8 = vpop.f32.mrb[8].mxu1 }
 0x70d   :  { %870 = vrot.lane.b32.xlu1 %v1546_v8, %s1866_s22  ;;  %v857_v10 = vpop.f32.mrb[9].mxu1 }
 0x710   :  { %v1560_v14 = vpop.f32.mrb[10].mxu1 }
 0x711   :  { %868 = vrot.lane.b32.xlu1 %v857_v10, %s1866_s22  ;;  %v1047_v15 = vpop.f32.mrb[11].mxu1 }
 0x712   :  { %1058 = vrot.lane.b32.xlu0 %v1047_v15, %s1880_s17 }
 0x715   :  { %968 = vrot.lane.b32.xlu1 %v1553_v2, %s1879_s30 }
 0x719   :  { %1060 = vrot.lane.b32.xlu1 %v1560_v14, %s1880_s17 }
 0x77c   :  { %v967_v18 = vpop.permute.xlu0 %966 }
 0x77f   :  { %v871_v17 = vpop.permute.xlu1 %870 }
 0x780   :  { %876 = vst.msk [vmem:[#allocation2 + $0x8] sm:$0xff] %vm874_vm6, %v871_v17 }
 0x783   :  { %v869_v19 = vpop.permute.xlu1 %868 }
 0x784   :  { %875 = vst.msk [vmem:[#allocation2] sm:$0xff] %vm874_vm6, %v869_v19  ;;  %v1059_v20 = vpop.permute.xlu0 %1058 }
 0x785   :  { %973 = vst.msk [vmem:[#allocation2] sm:$0xff] %vm972_vm7, %v967_v18 }
 0x786   :  { %1065 = vst.msk [vmem:[#allocation2] sm:$0xff] %vm1064_vm8, %v1059_v20 }
 0x787   :  { %v969_v21 = vpop.permute.xlu1 %968 }
 0x788   :  { %974 = vst.msk [vmem:[#allocation2 + $0x8] sm:$0xff] %vm972_vm7, %v969_v21 }
 0x78b   :  { %v1061_v22 = vpop.permute.xlu1 %1060 }
 0x78c   :  { %1066 = vst.msk [vmem:[#allocation2 + $0x8] sm:$0xff] %vm1064_vm8, %v1061_v22 }
 0x78d   :  { %v1067_v23 = vld [vmem:[#allocation2] sm:$0xff] }
 0x78e   :  { %1569 = vmatprep.mubr.msk.f32.mxu0 %vm79_vm0, %v1067_v23 }
 0x793   :  { %v1068_v24 = vld [vmem:[#allocation2 + $0x8] sm:$0xff] }
 0x794   :  { %1570 = vmatmul.mubr.msk.f32.vlgmr.msra.gmra.mrb[6].mxu0 %vm79_vm0, %v1068_v24 }
 0x795   :  { %1669 = vmatpush3.bf16.msra.mxu0 %v1666_v51 }
 0x867   :  { %v1571_v25 = vpop.f32.mrb[6].mxu0 }
 0x868   :  { %v2133_v26 = vadd.f32 %v1571_v25, %v1986_v1  ;;  %v1145_v27 = vpop.f32.mrb[7].mxu0  ;;  %v1658_v1 = vpack.c.bf16 %v1179_v34, %v1178_v33 }
 0x869   :  { %v2136_v28 = vadd.f32 %v1145_v27, %v1984_v0  ;;  %v1181_v0 = vld [vmem:[#allocation8 + $0x18] sm:$0xff] }
 0x86a   :  { %v1157_v29 = vmul.f32 %v2133_v26, %v2133_v26  ;;  %1659 = vmatprep.subr.bf16.mxu1 %v1658_v1  ;;  %v1662_v36 = vpack.c.bf16 %v1181_v0, %v1180_v35 }
 0x86b   :  { %v1156_v30 = vmul.f32 %v2136_v28, %v2136_v28  ;;  %1661 = vmatpush3.bf16.msra.mxu1 %v1658_v1 }
 0x86c   :  { %v1161_v31 = vsel %vm79_vm0, %v1157_v29, 0.0  ;;  %1663 = vmatprep.subr.bf16.mxu1 %v1662_v36 }
 0x86d   :  { %1162 = vadd.xlane.f32.xlu1 %v1161_v31  ;;  %v1158_v32 = vsel %vm79_vm0, %v1156_v30, 0.0 }
 0x86e   :  { %1159 = vadd.xlane.f32.xlu0 %v1158_v32 }
 0x86f   :  { %1665 = vmatpush3.bf16.msra.mxu1 %v1662_v36 }
 0x8fa   :  { %v1163_v37 = vpop.xlane.xlu1 %1162 }
 0x8fb   :  { %v1165_v38 = vmul.f32 0.03125, %v1163_v37  ;;  %v1160_v39 = vpop.xlane.xlu0 %1159 }
 0x8fc   :  { %v1164_v40 = vmul.f32 0.03125, %v1160_v39 }
 0x8fd   :  { %v1167_v41 = vadd.f32 1e-05, %v1165_v38 }
 0x8fe   :  { %v1166_v9 = vadd.f32 1e-05, %v1164_v40 }
 0x8ff   :  { %1757 = vrsqrt.f32 %v1167_v41 }
 0x900   :  { %1759 = vrsqrt.f32 %v1166_v9 }
 0x909   :  { %v1758_v42 = vpop.eup %1757 }
 0x90a   :  { %v1760_v43 = vpop.eup %1759  ;;  %v1171_v44 = vmul.f32 %v1758_v42, %v2133_v26 }
 0x90b   :  { %v1170_v45 = vmul.f32 %v1760_v43, %v2136_v28 }
 0x90c   :  { %v1177_v47 = vmul.f32 %v2009_v16, %v1171_v44 }
 0x90d   :  { %v1176_v46 = vmul.f32 %v2009_v16, %v1170_v45  ;;  %v1290_v16 = vld [vmem:[%s2202_s7 + $0x18] sm:$0xff]  ;;  %s1881_s7 = smov [#allocation9]  }
 0x90e   :  { %v1670_v52 = vpack.c.bf16 %v1290_v16, %v1289_v50 }
 0x90f   :  { %1580 = vmatprep.mubr.msk.f32.mxu1 %vm79_vm0, %v1176_v46 }
 0x910   :  { %1581 = vmatmul.mubr.msk.f32.vlgmr.msra.gmra.mrb[12].mxu1 %vm79_vm0, %v1177_v47  ;;  %1671 = vmatprep.subr.bf16.mxu0 %v1670_v52 }
 0x911   :  { %1673 = vmatpush3.bf16.msra.mxu0 %v1670_v52 }
 0x912   :  { %1675 = vmatprep.subr.bf16.mxu0 %v1674_v55 }
 0x915   :  { %1677 = vmatpush3.bf16.msra.mxu0 %v1674_v55 }
 0x916   :  { %1679 = vmatprep.subr.bf16.mxu0 %v1678_v58 }
 0x919   :  { %1681 = vmatpush3.bf16.msra.mxu0 %v1678_v58 }
 0x9e3   :  { %v1582_v59 = vpop.f32.mrb[12].mxu1 }
 0x9e4   :  { %1281 = vrot.lane.b32.xlu1 %v1582_v59, %s1868_s3  ;;  %v1254_v60 = vpop.f32.mrb[13].mxu1  ;;  %v1431_v62 = vmul.f32 -1.442695, %v1582_v59 }
 0x9e5   :  { %1279 = vrot.lane.b32.xlu0 %v1254_v60, %s1868_s3  ;;  %v1430_v61 = vmul.f32 -1.442695, %v1254_v60  ;;  %s1386_s3 = sshll.u32 %s1881_s7, 4  ;;  %s1387_s3 = int_to_ptr.vmem [resolvable:$true] %s1386_s3 }
 0x9e6   :  { %s1835_s30 = scalar_lea.vmem %s1387_s3, 256  ;;  %p1840_p11 = scmp.lt.s32.totalorder %s1387_s3, %s1387_s3 }
 0x9e7   :  { %1761 = vpow2.f32 %v1430_v61  ;;  %p1836_p10 = scmp.ne.s32.totalorder %s1387_s3, %s1835_s30  ;;  %p1841_p12 = scmp.lt.s32.totalorder %s1835_s30, %s1835_s30 }
 0x9e8   :  { %1763 = vpow2.f32 %v1431_v62 }
 0x9e9   :  { %p1842_p13 = por %p1841_p12, %p1840_p11 }
 0x9eb   :  { %p1843_p0 = pnand %p1842_p13, %p1836_p10 }
 0x9f1   :  { %v1762_v63 = vpop.eup %1761 }
 0x9f2   :  { %v1764_v2 = vpop.eup %1763  ;;  %v1269_v3 = vadd.f32 1.0, %v1762_v63 }
 0x9f3   :  { %v1270_v4 = vadd.f32 1.0, %v1764_v2 }
 0x9f4   :  { %1765 = vrcp.f32 %v1269_v3 }
 0x9f5   :  { %1767 = vrcp.f32 %v1270_v4 }
 0x9fe   :  { %v1766_v5 = vpop.eup %1765 }
 0x9ff   :  { %v1768_v6 = vpop.eup %1767  ;;  %v1275_v7 = vmul.f32 %v1766_v5, %v1254_v60 }
 0xa00   :  { %v1276_v10 = vmul.f32 %v1768_v6, %v1582_v59 }
 0xa56   :  { %v1282_v8 = vpop.permute.xlu1 %1281 }
 0xa57   :  { %v1280_v11 = vpop.permute.xlu0 %1279  ;;  %v1286_v13 = vmul.f32 %v1282_v8, %v1276_v10 }
 0xa58   :  { %v1285_v12 = vmul.f32 %v1280_v11, %v1275_v7 }
 0xa5a   :  { %1599 = vmatprep.mubr.msk.f32.mxu0 %vm1295_vm9, %v1285_v12 }
 0xa5b   :  { %1600 = vmatmul.mubr.msk.f32.vlgmr.msra.gmra.mrb[8].mxu0 %vm1295_vm9, %v1286_v13 }
 0xb2e   :  { %v1601_v14 = vpop.f32.mrb[8].mxu0 }
 0xb2f   :  { %v1378_v15 = vadd.f32 %v1601_v14, %v2133_v26  ;;  %v1368_v17 = vpop.f32.mrb[9].mxu0 }
 0xb30   :  { %v1377_v18 = vadd.f32 %v1368_v17, %v2136_v28 }
 0xb31   :  { %1380 = vst.msk [vmem:[#allocation9 + $0x8] sm:$0xff] %vm79_vm0, %v1378_v15 }
 0xb32   :  { %1379 = vst.msk [vmem:[#allocation9] sm:$0xff] %vm79_vm0, %v1377_v18 }
 0xb33   :  { %1846 = shalt.err (!%p1843_p0)
}
 0xb34   :  { %s1847_s1 = scalar_lea.hbm %s2204_s9, 256 }
 0xb35   :  { %p1848_p1 = scmp.ne.s32.totalorder %s2204_s9, %s1847_s1  ;;  %p1851_p2 = scmp.lt.u32.totalorder %s1847_s1, %s2204_s9 }
 0xb37   :  { %p1853_p3 = pnand %p1851_p2, %p1848_p1 }
 0xb39   :  { %1856 = shalt.err (!%p1853_p3)
}
 0xb3a   :  { %1392 = dma.vmem_to_hbm [thread:$0]  %s1387_s3, 256, %s2204_s9, [#allocation5], %s1865_s21, %s1865_s21, %s1866_s22  }
 0xb3b   :  { %1861 = dma.done.wait [#allocation5], 256  }
 0xb3c   :  { %1862 = vsyncadd [#allocation5], 4294967040 }
 0xb3d   :  { %1396 = vsyncpa [#allocation4], 1 }
 0xb3e   :  { %1397 = vsyncpa [#allocation7], 1 }
 0xb3f   :  { %1398 = vsyncpa [#allocation5], 1 }

</bundles_post_ra>
